<compile_context>
chip_gen: v7x
topology: tpu7x:2x2x1
jax: 0.10.0
libtpu: 0.0.40
codegen_flags: <defaults>
</compile_context>

<pallas_src>
import jax
import jax.numpy as jnp
from jax.experimental import pallas as pl
from jax.experimental.pallas import tpu as pltpu

EPS = 1e-5
C_PAD = 128   # lane-dense output width


# ----------------------------------------------------------------------------
# Pallas kernel: the entire GCN3 forward hot path, fused.
# Small synthetic shapes -> single grid point, every operand is one full-array
# VMEM block (full-dims blocks satisfy the (8,128) rule).
# ----------------------------------------------------------------------------
def gcn3_kernel(a_ref, x_ref, w1_ref, w23_ref, wlp_ref, bn_ref, bl_ref, out_ref):
    bf16 = jnp.bfloat16
    A = a_ref[...]                       # [N, N]  bf16 normalized adjacency
    x = x_ref[...]                       # [N, F]  f32
    bn = bn_ref[...]                     # [9, H]  f32 packed small params

    def gcn_relu_bn(h, w, b, gamma, beta):
        # GCNConv:  A_hat @ (H W) + b     (bf16 MXU inputs, f32 accumulation)
        z = jnp.dot(h.astype(bf16), w, preferred_element_type=jnp.float32)
        z = jnp.dot(A, z.astype(bf16), preferred_element_type=jnp.float32) + b
        # ReLU
        z = jnp.maximum(z, 0.0)
        # BatchNorm1d, training-mode batch statistics, one pass:
        #   var = E[z^2] - mu^2 ; fold gamma/beta into scale/shift.
        mu = jnp.mean(z, axis=0, keepdims=True)
        ex2 = jnp.mean(z * z, axis=0, keepdims=True)
        var = ex2 - mu * mu
        scale = gamma * jax.lax.rsqrt(var + EPS)
        shift = beta - mu * scale
        return z * scale + shift

    b1, b2, b3 = bn[0:1, :], bn[1:2, :], bn[2:3, :]
    g1, g2, g3 = bn[3:4, :], bn[4:5, :], bn[5:6, :]
    be1, be2, be3 = bn[6:7, :], bn[7:8, :], bn[8:9, :]

    o1 = gcn_relu_bn(x, w1_ref[...], b1, g1, be1)
    o2 = gcn_relu_bn(o1, w23_ref[0], b2, g2, be2)
    o3 = gcn_relu_bn(o2, w23_ref[1], b3, g3, be3)

    # Final Linear on concat([o1, o2, o3], dim=1): sum of three matmuls against
    # pre-sliced, lane-padded (H, C_PAD) weight blocks -> lane-dense store.
    out = (jnp.dot(o1.astype(bf16), wlp_ref[0], preferred_element_type=jnp.float32)
           + jnp.dot(o2.astype(bf16), wlp_ref[1], preferred_element_type=jnp.float32)
           + jnp.dot(o3.astype(bf16), wlp_ref[2], preferred_element_type=jnp.float32)
           + bl_ref[...])
    out_ref[...] = out.astype(out_ref.dtype)


def gcn3_forward(A_hat, x, params):
    N, _ = x.shape
    H = params["w1"].shape[1]
    C = params["wl"].shape[1]
    bf16 = jnp.bfloat16

    # bf16 MXU operands (halves VMEM footprint of A, doubles MXU throughput).
    A_bf = A_hat.astype(bf16)
    w1 = params["w1"].astype(bf16)                                   # [F, H]
    w23 = jnp.stack([params["w2"], params["w3"]]).astype(bf16)       # [2, H, H]

    # Pre-slice wl per layer and lane-pad the class dim to C_PAD (zero cols).
    wl = params["wl"]                                                # [3H, C]
    wl_slices = jnp.stack([wl[0 * H:1 * H], wl[1 * H:2 * H], wl[2 * H:3 * H]])
    wlp = (jnp.zeros((3, H, C_PAD), jnp.float32)
           .at[:, :, :C].set(wl_slices).astype(bf16))                # [3, H, 128]
    bl_pad = jnp.zeros((1, C_PAD), jnp.float32).at[:, :C].set(params["bl"])

    # Pack the nine tiny (1, H) bias / BN-affine params into a single array.
    bn_pack = jnp.concatenate(
        [params["b1"], params["b2"], params["b3"],
         params["g1"], params["g2"], params["g3"],
         params["be1"], params["be2"], params["be3"]], axis=0)       # [9, H]

    args = (A_bf, x, w1, w23, wlp, bn_pack, bl_pad)
    out_pad = pl.pallas_call(
        gcn3_kernel,
        out_shape=jax.ShapeDtypeStruct((N, C_PAD), jnp.float32),
        in_specs=[pl.BlockSpec(memory_space=pltpu.MemorySpace.VMEM)] * len(args),
        out_specs=pl.BlockSpec(memory_space=pltpu.MemorySpace.VMEM),
    )(*args)
    # TODO(synk): for large N (dense A_hat ~ N^2 bytes) switch to a row-tiled
    # grid (parallel node-row axis) or sparse gather-based aggregation; the
    # single-block design here targets small graphs only.
    return out_pad[:, :C]


# ----------------------------------------------------------------------------
# Glue: dense normalized adjacency (PyG GCNConv gcn_norm with self-loops).
# ----------------------------------------------------------------------------
def build_normalized_adjacency(edge_index, edge_weights, num_nodes):
    src, dst = edge_index[0], edge_index[1]
    loop = jnp.arange(num_nodes, dtype=src.dtype)
    src = jnp.concatenate([src, loop])
    dst = jnp.concatenate([dst, loop])
    w = jnp.concatenate([edge_weights, jnp.ones((num_nodes,), jnp.float32)])
    deg = jnp.zeros((num_nodes,), jnp.float32).at[dst].add(w)
    dinv = jnp.where(deg > 0, jax.lax.rsqrt(deg), 0.0)
    norm = dinv[src] * w * dinv[dst]
    # aggregation: out[dst] += norm * x[src]  ->  A_hat[dst, src] = norm
    A = jnp.zeros((num_nodes, num_nodes), jnp.float32).at[dst, src].add(norm)
    return A


# Pure-JAX reference (same bf16-input / f32-accumulate matmul convention).
def gcn3_reference(A, x, p):
    bf16 = jnp.bfloat16
    Ab = A.astype(bf16)

    def layer(h, w, b, g, be):
        z = jnp.dot(h.astype(bf16), w.astype(bf16), preferred_element_type=jnp.float32)
        z = jnp.dot(Ab, z.astype(bf16), preferred_element_type=jnp.float32) + b
        z = jnp.maximum(z, 0.0)
        mu = jnp.mean(z, axis=0, keepdims=True)
        var = jnp.mean((z - mu) ** 2, axis=0, keepdims=True)
        return (z - mu) / jnp.sqrt(var + EPS) * g + be

    o1 = layer(x, p["w1"], p["b1"], p["g1"], p["be1"])
    o2 = layer(o1, p["w2"], p["b2"], p["g2"], p["be2"])
    o3 = layer(o2, p["w3"], p["b3"], p["g3"], p["be3"])
    rep = jnp.concatenate([o1, o2, o3], axis=1)
    return jnp.dot(rep.astype(bf16), p["wl"].astype(bf16),
                   preferred_element_type=jnp.float32) + p["bl"]


if __name__ == "__main__":
    key = jax.random.PRNGKey(0)

    # Small shapes: N nodes, num_features, hidden_size, num_classes.
    N, F, H, C = 16, 8, 32, 4
    E = 40  # number of (directed) edges

    keys = jax.random.split(key, 12)
    x = jax.random.normal(keys[0], (N, F), jnp.float32)
    edge_index = jax.random.randint(keys[1], (2, E), 0, N, dtype=jnp.int32)
    edge_weights = jnp.ones((E,), jnp.float32)  # forward() default

    def init_w(k, shape, scale=0.1):
        return scale * jax.random.normal(k, shape, jnp.float32)

    params = {
        # GCNConv weights [in, out], biases [1, out]
        "w1": init_w(keys[2], (F, H)), "b1": init_w(keys[3], (1, H)),
        "w2": init_w(keys[4], (H, H)), "b2": init_w(keys[5], (1, H)),
        "w3": init_w(keys[6], (H, H)), "b3": init_w(keys[7], (1, H)),
        # BatchNorm affine params (PyTorch default init: gamma=1, beta=0)
        "g1": jnp.ones((1, H), jnp.float32), "be1": jnp.zeros((1, H), jnp.float32),
        "g2": jnp.ones((1, H), jnp.float32), "be2": jnp.zeros((1, H), jnp.float32),
        "g3": jnp.ones((1, H), jnp.float32), "be3": jnp.zeros((1, H), jnp.float32),
        # Final Linear: [3H, C] weight, [1, C] bias
        "wl": init_w(keys[8], (3 * H, C)), "bl": init_w(keys[9], (1, C)),
    }

    A_hat = build_normalized_adjacency(edge_index, edge_weights, N)

    out = gcn3_forward(A_hat, x, params)
    jax.block_until_ready(out)

    ref = gcn3_reference(A_hat, x, params)
    assert out.shape == (N, C)
    assert jnp.allclose(out, ref, atol=1e-2, rtol=1e-2), "mismatch vs reference"

    # TODO(synk): BatchNorm modeled with training-mode batch statistics only
    # (module default training=True); the running-stat eval path is not modeled.
    print("KERNEL_OK")
</pallas_src>

<mosaic_0001>
module attributes {stable_mosaic.version = 11 : i64} {
  func.func @gcn3_kernel(%arg0: memref<16x16xbf16, #tpu.memory_space<vmem>>, %arg1: memref<16x8xf32, #tpu.memory_space<vmem>>, %arg2: memref<8x32xbf16, #tpu.memory_space<vmem>>, %arg3: memref<2x32x32xbf16, #tpu.memory_space<vmem>>, %arg4: memref<3x32x128xbf16, #tpu.memory_space<vmem>>, %arg5: memref<9x32xf32, #tpu.memory_space<vmem>>, %arg6: memref<1x128xf32, #tpu.memory_space<vmem>>, %arg7: memref<16x128xf32, #tpu.memory_space<vmem>>) attributes {dimension_semantics = [], scalar_prefetch = 0 : i64, scratch_operands = 0 : i64, tpu.core_type = #tpu.core_type<tc>} {
    %c0 = arith.constant 0 : index
    %c0_0 = arith.constant 0 : index
    %0 = vector.load %arg0[%c0, %c0_0] : memref<16x16xbf16, #tpu.memory_space<vmem>>, vector<16x16xbf16>
    %c0_1 = arith.constant 0 : index
    %c0_2 = arith.constant 0 : index
    %1 = vector.load %arg1[%c0_1, %c0_2] : memref<16x8xf32, #tpu.memory_space<vmem>>, vector<16x8xf32>
    %c0_3 = arith.constant 0 : index
    %c0_4 = arith.constant 0 : index
    %2 = vector.load %arg5[%c0_3, %c0_4] : memref<9x32xf32, #tpu.memory_space<vmem>>, vector<9x32xf32>
    %3 = vector.extract_strided_slice %2 {offsets = [0, 0], sizes = [1, 32], strides = [1, 1]} : vector<9x32xf32> to vector<1x32xf32>
    %4 = vector.extract_strided_slice %2 {offsets = [1, 0], sizes = [1, 32], strides = [1, 1]} : vector<9x32xf32> to vector<1x32xf32>
    %5 = vector.extract_strided_slice %2 {offsets = [2, 0], sizes = [1, 32], strides = [1, 1]} : vector<9x32xf32> to vector<1x32xf32>
    %6 = vector.extract_strided_slice %2 {offsets = [3, 0], sizes = [1, 32], strides = [1, 1]} : vector<9x32xf32> to vector<1x32xf32>
    %7 = vector.extract_strided_slice %2 {offsets = [4, 0], sizes = [1, 32], strides = [1, 1]} : vector<9x32xf32> to vector<1x32xf32>
    %8 = vector.extract_strided_slice %2 {offsets = [5, 0], sizes = [1, 32], strides = [1, 1]} : vector<9x32xf32> to vector<1x32xf32>
    %9 = vector.extract_strided_slice %2 {offsets = [6, 0], sizes = [1, 32], strides = [1, 1]} : vector<9x32xf32> to vector<1x32xf32>
    %10 = vector.extract_strided_slice %2 {offsets = [7, 0], sizes = [1, 32], strides = [1, 1]} : vector<9x32xf32> to vector<1x32xf32>
    %11 = vector.extract_strided_slice %2 {offsets = [8, 0], sizes = [1, 32], strides = [1, 1]} : vector<9x32xf32> to vector<1x32xf32>
    %c0_5 = arith.constant 0 : index
    %c0_6 = arith.constant 0 : index
    %12 = vector.load %arg2[%c0_5, %c0_6] : memref<8x32xbf16, #tpu.memory_space<vmem>>, vector<8x32xbf16>
    %13 = arith.truncf %1 : vector<16x8xf32> to vector<16x8xbf16>
    %cst = arith.constant dense<0.000000e+00> : vector<16x32xf32>
    %14 = tpu.matmul %13, %12, %cst {dimension_numbers = #tpu.dot_dimension_numbers<[1], [0], [0], [1], [0, 0, 1, 1], [], []>} : vector<16x8xbf16>, vector<8x32xbf16>, vector<16x32xf32> -> vector<16x32xf32>
    %15 = arith.truncf %14 : vector<16x32xf32> to vector<16x32xbf16>
    %cst_7 = arith.constant dense<0.000000e+00> : vector<16x32xf32>
    %16 = tpu.matmul %0, %15, %cst_7 {dimension_numbers = #tpu.dot_dimension_numbers<[1], [0], [0], [1], [0, 0, 1, 1], [], []>} : vector<16x16xbf16>, vector<16x32xbf16>, vector<16x32xf32> -> vector<16x32xf32>
    %17 = vector.broadcast %3 : vector<1x32xf32> to vector<16x32xf32>
    %18 = arith.addf %16, %17 : vector<16x32xf32>
    %cst_8 = arith.constant 0.000000e+00 : f32
    %19 = vector.broadcast %cst_8 : f32 to vector<16x32xf32>
    %20 = arith.maximumf %18, %19 : vector<16x32xf32>
    %cst_9 = arith.constant dense<0.000000e+00> : vector<32xf32>
    %21 = vector.multi_reduction <add>, %20, %cst_9 [0] : vector<16x32xf32> to vector<32xf32>
    %22 = vector.shape_cast %21 : vector<32xf32> to vector<1x32xf32>
    %cst_10 = arith.constant 1.600000e+01 : f32
    %23 = vector.broadcast %cst_10 : f32 to vector<1x32xf32>
    %24 = arith.divf %22, %23 : vector<1x32xf32>
    %25 = arith.mulf %20, %20 : vector<16x32xf32>
    %cst_11 = arith.constant dense<0.000000e+00> : vector<32xf32>
    %26 = vector.multi_reduction <add>, %25, %cst_11 [0] : vector<16x32xf32> to vector<32xf32>
    %27 = vector.shape_cast %26 : vector<32xf32> to vector<1x32xf32>
    %cst_12 = arith.constant 1.600000e+01 : f32
    %28 = vector.broadcast %cst_12 : f32 to vector<1x32xf32>
    %29 = arith.divf %27, %28 : vector<1x32xf32>
    %30 = arith.mulf %24, %24 : vector<1x32xf32>
    %31 = arith.subf %29, %30 : vector<1x32xf32>
    %cst_13 = arith.constant 9.99999974E-6 : f32
    %32 = vector.broadcast %cst_13 : f32 to vector<1x32xf32>
    %33 = arith.addf %31, %32 : vector<1x32xf32>
    %34 = math.rsqrt %33 : vector<1x32xf32>
    %35 = arith.mulf %6, %34 : vector<1x32xf32>
    %36 = arith.mulf %24, %35 : vector<1x32xf32>
    %37 = arith.subf %9, %36 : vector<1x32xf32>
    %38 = vector.broadcast %35 : vector<1x32xf32> to vector<16x32xf32>
    %39 = arith.mulf %20, %38 : vector<16x32xf32>
    %40 = vector.broadcast %37 : vector<1x32xf32> to vector<16x32xf32>
    %41 = arith.addf %39, %40 : vector<16x32xf32>
    %c0_14 = arith.constant 0 : index
    %c0_15 = arith.constant 0 : index
    %c0_16 = arith.constant 0 : index
    %42 = vector.load %arg3[%c0_14, %c0_15, %c0_16] : memref<2x32x32xbf16, #tpu.memory_space<vmem>>, vector<1x32x32xbf16>
    %43 = vector.shape_cast %42 : vector<1x32x32xbf16> to vector<32x32xbf16>
    %44 = arith.truncf %41 : vector<16x32xf32> to vector<16x32xbf16>
    %cst_17 = arith.constant dense<0.000000e+00> : vector<16x32xf32>
    %45 = tpu.matmul %44, %43, %cst_17 {dimension_numbers = #tpu.dot_dimension_numbers<[1], [0], [0], [1], [0, 0, 1, 1], [], []>} : vector<16x32xbf16>, vector<32x32xbf16>, vector<16x32xf32> -> vector<16x32xf32>
    %46 = arith.truncf %45 : vector<16x32xf32> to vector<16x32xbf16>
    %cst_18 = arith.constant dense<0.000000e+00> : vector<16x32xf32>
    %47 = tpu.matmul %0, %46, %cst_18 {dimension_numbers = #tpu.dot_dimension_numbers<[1], [0], [0], [1], [0, 0, 1, 1], [], []>} : vector<16x16xbf16>, vector<16x32xbf16>, vector<16x32xf32> -> vector<16x32xf32>
    %48 = vector.broadcast %4 : vector<1x32xf32> to vector<16x32xf32>
    %49 = arith.addf %47, %48 : vector<16x32xf32>
    %cst_19 = arith.constant 0.000000e+00 : f32
    %50 = vector.broadcast %cst_19 : f32 to vector<16x32xf32>
    %51 = arith.maximumf %49, %50 : vector<16x32xf32>
    %cst_20 = arith.constant dense<0.000000e+00> : vector<32xf32>
    %52 = vector.multi_reduction <add>, %51, %cst_20 [0] : vector<16x32xf32> to vector<32xf32>
    %53 = vector.shape_cast %52 : vector<32xf32> to vector<1x32xf32>
    %cst_21 = arith.constant 1.600000e+01 : f32
    %54 = vector.broadcast %cst_21 : f32 to vector<1x32xf32>
    %55 = arith.divf %53, %54 : vector<1x32xf32>
    %56 = arith.mulf %51, %51 : vector<16x32xf32>
    %cst_22 = arith.constant dense<0.000000e+00> : vector<32xf32>
    %57 = vector.multi_reduction <add>, %56, %cst_22 [0] : vector<16x32xf32> to vector<32xf32>
    %58 = vector.shape_cast %57 : vector<32xf32> to vector<1x32xf32>
    %cst_23 = arith.constant 1.600000e+01 : f32
    %59 = vector.broadcast %cst_23 : f32 to vector<1x32xf32>
    %60 = arith.divf %58, %59 : vector<1x32xf32>
    %61 = arith.mulf %55, %55 : vector<1x32xf32>
    %62 = arith.subf %60, %61 : vector<1x32xf32>
    %cst_24 = arith.constant 9.99999974E-6 : f32
    %63 = vector.broadcast %cst_24 : f32 to vector<1x32xf32>
    %64 = arith.addf %62, %63 : vector<1x32xf32>
    %65 = math.rsqrt %64 : vector<1x32xf32>
    %66 = arith.mulf %7, %65 : vector<1x32xf32>
    %67 = arith.mulf %55, %66 : vector<1x32xf32>
    %68 = arith.subf %10, %67 : vector<1x32xf32>
    %69 = vector.broadcast %66 : vector<1x32xf32> to vector<16x32xf32>
    %70 = arith.mulf %51, %69 : vector<16x32xf32>
    %71 = vector.broadcast %68 : vector<1x32xf32> to vector<16x32xf32>
    %72 = arith.addf %70, %71 : vector<16x32xf32>
    %c1 = arith.constant 1 : index
    %c0_25 = arith.constant 0 : index
    %c0_26 = arith.constant 0 : index
    %73 = vector.load %arg3[%c1, %c0_25, %c0_26] : memref<2x32x32xbf16, #tpu.memory_space<vmem>>, vector<1x32x32xbf16>
    %74 = vector.shape_cast %73 : vector<1x32x32xbf16> to vector<32x32xbf16>
    %75 = arith.truncf %72 : vector<16x32xf32> to vector<16x32xbf16>
    %cst_27 = arith.constant dense<0.000000e+00> : vector<16x32xf32>
    %76 = tpu.matmul %75, %74, %cst_27 {dimension_numbers = #tpu.dot_dimension_numbers<[1], [0], [0], [1], [0, 0, 1, 1], [], []>} : vector<16x32xbf16>, vector<32x32xbf16>, vector<16x32xf32> -> vector<16x32xf32>
    %77 = arith.truncf %76 : vector<16x32xf32> to vector<16x32xbf16>
    %cst_28 = arith.constant dense<0.000000e+00> : vector<16x32xf32>
    %78 = tpu.matmul %0, %77, %cst_28 {dimension_numbers = #tpu.dot_dimension_numbers<[1], [0], [0], [1], [0, 0, 1, 1], [], []>} : vector<16x16xbf16>, vector<16x32xbf16>, vector<16x32xf32> -> vector<16x32xf32>
    %79 = vector.broadcast %5 : vector<1x32xf32> to vector<16x32xf32>
    %80 = arith.addf %78, %79 : vector<16x32xf32>
    %cst_29 = arith.constant 0.000000e+00 : f32
    %81 = vector.broadcast %cst_29 : f32 to vector<16x32xf32>
    %82 = arith.maximumf %80, %81 : vector<16x32xf32>
    %cst_30 = arith.constant dense<0.000000e+00> : vector<32xf32>
    %83 = vector.multi_reduction <add>, %82, %cst_30 [0] : vector<16x32xf32> to vector<32xf32>
    %84 = vector.shape_cast %83 : vector<32xf32> to vector<1x32xf32>
    %cst_31 = arith.constant 1.600000e+01 : f32
    %85 = vector.broadcast %cst_31 : f32 to vector<1x32xf32>
    %86 = arith.divf %84, %85 : vector<1x32xf32>
    %87 = arith.mulf %82, %82 : vector<16x32xf32>
    %cst_32 = arith.constant dense<0.000000e+00> : vector<32xf32>
    %88 = vector.multi_reduction <add>, %87, %cst_32 [0] : vector<16x32xf32> to vector<32xf32>
    %89 = vector.shape_cast %88 : vector<32xf32> to vector<1x32xf32>
    %cst_33 = arith.constant 1.600000e+01 : f32
    %90 = vector.broadcast %cst_33 : f32 to vector<1x32xf32>
    %91 = arith.divf %89, %90 : vector<1x32xf32>
    %92 = arith.mulf %86, %86 : vector<1x32xf32>
    %93 = arith.subf %91, %92 : vector<1x32xf32>
    %cst_34 = arith.constant 9.99999974E-6 : f32
    %94 = vector.broadcast %cst_34 : f32 to vector<1x32xf32>
    %95 = arith.addf %93, %94 : vector<1x32xf32>
    %96 = math.rsqrt %95 : vector<1x32xf32>
    %97 = arith.mulf %8, %96 : vector<1x32xf32>
    %98 = arith.mulf %86, %97 : vector<1x32xf32>
    %99 = arith.subf %11, %98 : vector<1x32xf32>
    %100 = vector.broadcast %97 : vector<1x32xf32> to vector<16x32xf32>
    %101 = arith.mulf %82, %100 : vector<16x32xf32>
    %102 = vector.broadcast %99 : vector<1x32xf32> to vector<16x32xf32>
    %103 = arith.addf %101, %102 : vector<16x32xf32>
    %104 = arith.truncf %41 : vector<16x32xf32> to vector<16x32xbf16>
    %c0_35 = arith.constant 0 : index
    %c0_36 = arith.constant 0 : index
    %c0_37 = arith.constant 0 : index
    %105 = vector.load %arg4[%c0_35, %c0_36, %c0_37] : memref<3x32x128xbf16, #tpu.memory_space<vmem>>, vector<1x32x128xbf16>
    %106 = vector.shape_cast %105 : vector<1x32x128xbf16> to vector<32x128xbf16>
    %cst_38 = arith.constant dense<0.000000e+00> : vector<16x128xf32>
    %107 = tpu.matmul %104, %106, %cst_38 {dimension_numbers = #tpu.dot_dimension_numbers<[1], [0], [0], [1], [0, 0, 1, 1], [], []>} : vector<16x32xbf16>, vector<32x128xbf16>, vector<16x128xf32> -> vector<16x128xf32>
    %108 = arith.truncf %72 : vector<16x32xf32> to vector<16x32xbf16>
    %c1_39 = arith.constant 1 : index
    %c0_40 = arith.constant 0 : index
    %c0_41 = arith.constant 0 : index
    %109 = vector.load %arg4[%c1_39, %c0_40, %c0_41] : memref<3x32x128xbf16, #tpu.memory_space<vmem>>, vector<1x32x128xbf16>
    %110 = vector.shape_cast %109 : vector<1x32x128xbf16> to vector<32x128xbf16>
    %cst_42 = arith.constant dense<0.000000e+00> : vector<16x128xf32>
    %111 = tpu.matmul %108, %110, %cst_42 {dimension_numbers = #tpu.dot_dimension_numbers<[1], [0], [0], [1], [0, 0, 1, 1], [], []>} : vector<16x32xbf16>, vector<32x128xbf16>, vector<16x128xf32> -> vector<16x128xf32>
    %112 = arith.addf %107, %111 : vector<16x128xf32>
    %113 = arith.truncf %103 : vector<16x32xf32> to vector<16x32xbf16>
    %c2 = arith.constant 2 : index
    %c0_43 = arith.constant 0 : index
    %c0_44 = arith.constant 0 : index
    %114 = vector.load %arg4[%c2, %c0_43, %c0_44] : memref<3x32x128xbf16, #tpu.memory_space<vmem>>, vector<1x32x128xbf16>
    %115 = vector.shape_cast %114 : vector<1x32x128xbf16> to vector<32x128xbf16>
    %cst_45 = arith.constant dense<0.000000e+00> : vector<16x128xf32>
    %116 = tpu.matmul %113, %115, %cst_45 {dimension_numbers = #tpu.dot_dimension_numbers<[1], [0], [0], [1], [0, 0, 1, 1], [], []>} : vector<16x32xbf16>, vector<32x128xbf16>, vector<16x128xf32> -> vector<16x128xf32>
    %117 = arith.addf %112, %116 : vector<16x128xf32>
    %c0_46 = arith.constant 0 : index
    %c0_47 = arith.constant 0 : index
    %118 = vector.load %arg6[%c0_46, %c0_47] : memref<1x128xf32, #tpu.memory_space<vmem>>, vector<1x128xf32>
    %119 = vector.broadcast %118 : vector<1x128xf32> to vector<16x128xf32>
    %120 = arith.addf %117, %119 : vector<16x128xf32>
    %c0_48 = arith.constant 0 : index
    %c0_49 = arith.constant 0 : index
    %121 = vector.load %arg7[%c0_48, %c0_49] : memref<16x128xf32, #tpu.memory_space<vmem>>, vector<16x128xf32>
    tpu.vector_store %arg7[%c0_48, %c0_49], %120 {strides = array<i32>} : memref<16x128xf32, #tpu.memory_space<vmem>>, vector<16x128xf32>,
    return
  }
}

</mosaic_0001>

<bundles_post_ra>
// kernel: tpu_custom_call.1
= control target key start
LH: loop header
LB: loop body
LE: loop exit
PB: predicated region body
PF: predicated region fallthrough
CT: control target
= control target key end

     0   :  { %12 = vsyncpa [#allocation3], 0  ;;  %s1252_s0 = inlined_call_operand.hbm [shape: bf16[16,16], index: 0, kind: input, shape index: {}]   ;;  %s1253_s1 = inlined_call_operand.vmem [shape: f32[16,8], index: 1, kind: input, shape index: {}]   ;;  %s1254_s2 = inlined_call_operand.hbm [shape: bf16[8,32], index: 2, kind: input, shape index: {}]   ;;  %s1255_s3 = inlined_call_operand.vmem [shape: bf16[2,32,32], index: 3, kind: input, shape index: {}]   ;;  %s1256_s4 = inlined_call_operand.hbm [shape: bf16[3,32,128], index: 4, kind: input, shape index: {}]   ;;  %s1257_s5 = inlined_call_operand.hbm [shape: f32[9,32], index: 5, kind: input, shape index: {}]   ;;  %s1258_s6 = inlined_call_operand.vmem [shape: f32[1,128], index: 6, kind: input, shape index: {}]   ;;  %s1259_s7 = inlined_call_operand.hbm [shape: f32[16,128], index: 7, kind: output, shape index: {}]  }
   0x1   :  { %13 = vsyncpa [#allocation6], 0 }
   0x2   :  { %14 = vsyncpa [#allocation9], 0 }
   0x3   :  { %15 = vsyncpa [#allocation4], 0  ;;  %s1015_s24 = smov [#allocation5]   ;;  %s1016_s26 = smov [#allocation2]  }
   0x4   :  { %s36_s25 = sshll.u32 %s1015_s24, 4  ;;  %s21_s27 = sshll.u32 %s1016_s26, 4  ;;  %s37_s25 = int_to_ptr.vmem [resolvable:$true] %s36_s25  ;;  %s1066_s27 = int_to_ptr.vmem [resolvable:$true] %s21_s27 }
   0x5   :  { %s897_s30 = scalar_lea.hbm %s1254_s2, 64 }
   0x6   :  { %p898_p0 = scmp.ne.s32.totalorder %s1254_s2, %s897_s30  ;;  %p901_p1 = scmp.lt.u32.totalorder %s897_s30, %s1254_s2 }
   0x8   :  { %p903_p2 = pnand %p901_p1, %p898_p0 }
   0xa   :  { %906 = shalt.err (!%p903_p2)
}
   0xb   :  { %s907_s12 = scalar_lea.vmem %s37_s25, 64  ;;  %p912_p4 = scmp.lt.s32.totalorder %s37_s25, %s37_s25 }
   0xc   :  { %p908_p3 = scmp.ne.s32.totalorder %s37_s25, %s907_s12  ;;  %p913_p5 = scmp.lt.s32.totalorder %s907_s12, %s907_s12 }
   0xe   :  { %p914_p6 = por %p913_p5, %p912_p4 }
  0x10   :  { %p915_p7 = pnand %p914_p6, %p908_p3 }
  0x12   :  { %918 = shalt.err (!%p915_p7)
}
  0x13   :  { %39 = dma.hbm_to_vmem [thread:$0]  %s1254_s2, 64, %s37_s25, [#allocation6]  }
  0x14   :  { %s919_s17 = scalar_lea.hbm %s1252_s0, 128 }
  0x15   :  { %p920_p8 = scmp.ne.s32.totalorder %s1252_s0, %s919_s17  ;;  %p923_p9 = scmp.lt.u32.totalorder %s919_s17, %s1252_s0 }
  0x17   :  { %p925_p10 = pnand %p923_p9, %p920_p8 }
  0x19   :  { %928 = shalt.err (!%p925_p10)
}
  0x1a   :  { %s929_s22 = scalar_lea.vmem %s1066_s27, 128  ;;  %p934_p12 = scmp.lt.s32.totalorder %s1066_s27, %s1066_s27 }
  0x1b   :  { %p930_p11 = scmp.ne.s32.totalorder %s1066_s27, %s929_s22  ;;  %p935_p13 = scmp.lt.s32.totalorder %s929_s22, %s929_s22 }
  0x1d   :  { %p936_p0 = por %p935_p13, %p934_p12 }
  0x1f   :  { %p937_p1 = pnand %p936_p0, %p930_p11 }
  0x21   :  { %940 = shalt.err (!%p937_p1)
}
  0x22   :  { %s1017_s2 = smov 64   ;;  %s1018_s23 = smov 4  }
  0x23   :  { %27 = dma.hbm_to_vmem [thread:$0]  %s1252_s0, 128, %s1066_s27, [#allocation3], %s1017_s2, %s1017_s2, %s1018_s23  }
  0x24   :  { %s1019_s26 = smov [#allocation7]   ;;  %s1020_s29 = smov [#allocation8]  }
  0x25   :  { %s47_s28 = sshll.u32 %s1019_s26, 4  ;;  %s59_s30 = sshll.u32 %s1020_s29, 4  ;;  %s48_s28 = int_to_ptr.vmem [resolvable:$true] %s47_s28  ;;  %s1097_s30 = int_to_ptr.vmem [resolvable:$true] %s59_s30 }
  0x26   :  { %s941_s10 = scalar_lea.hbm %s1256_s4, 768 }
  0x27   :  { %p942_p2 = scmp.ne.s32.totalorder %s1256_s4, %s941_s10  ;;  %p945_p3 = scmp.lt.u32.totalorder %s941_s10, %s1256_s4 }
  0x29   :  { %p947_p4 = pnand %p945_p3, %p942_p2 }
  0x2b   :  { %950 = shalt.err (!%p947_p4)
}
  0x2c   :  { %s951_s0 = scalar_lea.vmem %s48_s28, 768  ;;  %p956_p6 = scmp.lt.s32.totalorder %s48_s28, %s48_s28 }
  0x2d   :  { %p952_p5 = scmp.ne.s32.totalorder %s48_s28, %s951_s0  ;;  %p957_p7 = scmp.lt.s32.totalorder %s951_s0, %s951_s0 }
  0x2f   :  { %p958_p8 = por %p957_p7, %p956_p6 }
  0x31   :  { %p959_p9 = pnand %p958_p8, %p952_p5 }
  0x33   :  { %962 = shalt.err (!%p959_p9)
}
  0x34   :  { %53 = dma.hbm_to_vmem [thread:$0]  %s1256_s4, 768, %s48_s28, [#allocation6], %s1017_s2, %s1017_s2, %s1018_s23  }
  0x35   :  { %s963_s18 = scalar_lea.hbm %s1257_s5, 256 }
  0x36   :  { %p964_p10 = scmp.ne.s32.totalorder %s1257_s5, %s963_s18  ;;  %p967_p11 = scmp.lt.u32.totalorder %s963_s18, %s1257_s5 }
  0x38   :  { %p969_p12 = pnand %p967_p11, %p964_p10 }
  0x3a   :  { %972 = shalt.err (!%p969_p12)
}
  0x3b   :  { %s973_s24 = scalar_lea.vmem %s1097_s30, 256  ;;  %p978_p0 = scmp.lt.s32.totalorder %s1097_s30, %s1097_s30 }
  0x3c   :  { %p974_p13 = scmp.ne.s32.totalorder %s1097_s30, %s973_s24  ;;  %p979_p1 = scmp.lt.s32.totalorder %s973_s24, %s973_s24 }
  0x3e   :  { %p980_p2 = por %p979_p1, %p978_p0 }
  0x40   :  { %p981_p3 = pnand %p980_p2, %p974_p13 }
  0x42   :  { %984 = shalt.err (!%p981_p3)
}
  0x43   :  { %s1021_s4 = smov 128   ;;  %s1022_s2 = smov 8  }
  0x44   :  { %65 = dma.hbm_to_vmem [thread:$0]  %s1257_s5, 256, %s1097_s30, [#allocation9], %s1021_s4, %s1021_s4, %s1022_s2  }
  0x45   :  { %1007 = dma.done.wait [#allocation3], 128  }
  0x46   :  { %1008 = vsyncadd [#allocation3], 4294967168 }
  0x47   :  { %1009 = dma.done.wait [#allocation6], 832  }
  0x48   :  { %1010 = vsyncadd [#allocation6], 4294966464 }
  0x49   :  { %1011 = dma.done.wait [#allocation9], 256  }
  0x4a   :  { %1012 = vsyncadd [#allocation9], 4294967040  ;;  %v1023_v0 = vmov 0.0   ;;  %vm1024_vm0 = vmmov 0   ;;  %vm93_vm1 = vcmask 1043456   ;;  %v83_v2 = vld [vmem:[%s1253_s1] sm:$0xff]  ;;  %v139_v14 = vlaneseq }
  0x4b   :  { %805 = vmatprep.subr.bf16.mxu0 %v1023_v0  ;;  %807 = vmatprep.mubr.msk.bf16.mxu0 %vm1024_vm0, %v1023_v0  ;;  %v87_v1 = vld [vmem:[#allocation5] sm:$0xf]  ;;  %vm89_vm2 = vcmask 64512   ;;  %v1146_v11 = vld [vmem:[#allocation2] sm:$0xff]   ;;  %vm148_vm3 = vcmask 130048   ;;  %vm195_vm4 = vcmask 261120  }
  0x4c   :  { %811 = vmatprep.subr.bf16.mxu1 %v1023_v0  ;;  %813 = vmatprep.mubr.msk.bf16.mxu1 %vm1024_vm0, %v1023_v0  ;;  %v84_v3 = vld [vmem:[%s1253_s1 + $0x8] sm:$0xff]  ;;  %v95_v4 = vsel %vm93_vm1, %v87_v1, 0  ;;  %v881_v12 = vld [vmem:[%s1255_s3] sm:$0xff]   ;;  %v1161_v15 = vshrl.u32 %v139_v14, 7  ;;  %s1025_s0 = smov [#allocation10]  }
  0x4d   :  { %v88_v5 = vpack.c.bf16 %v84_v3, %v83_v2  ;;  %806 = vmatpush3.bf16.msra.mxu0 %v95_v4  ;;  %v882_v13 = vld [vmem:[%s1255_s3 + $0x8] sm:$0xff]   ;;  %v1164_v17 = vld [vmem:[#allocation8] sm:$0xff]  ;;  %s743_s27 = sshll.u32 %s1025_s0, 4  ;;  %s744_s27 = int_to_ptr.vmem [resolvable:$true] %s743_s27 }
  0x4e   :  { %817 = vmatprep.subr.bf16.mxu0 %v1023_v0  ;;  %v141_v16 = vsub.s32 0, %v1161_v15  ;;  %v231_v52 = vsub.s32 3, %v1161_v15  ;;  %v237_v60 = vsub.s32 6, %v1161_v15  ;;  %s985_s15 = scalar_lea.vmem %s744_s27, 256  ;;  %p990_p5 = scmp.lt.s32.totalorder %s744_s27, %s744_s27 }
  0x4f   :  { %p986_p4 = scmp.ne.s32.totalorder %s744_s27, %s985_s15  ;;  %p991_p6 = scmp.lt.s32.totalorder %s985_s15, %s985_s15 }
  0x50   :  { %808 = vmatmul.mubr.msk.bf16.vlgmr.msra.gmra.mrb[0].mxu0 %vm89_vm2, %v88_v5  ;;  %v142_v18 = vrot.slane %v1164_v17, %v141_v16 }
  0x51   :  { %821 = vmatprep.mubr.msk.bf16.mxu0 %vm1024_vm0, %v1023_v0  ;;  %818 = vmatpush3.bf16.msra.mxu0 %v881_v12  ;;  %p992_p7 = por %p991_p6, %p990_p5 }
  0x52   :  { %819 = vmatprep.subr.bf16.mxu0 %v1023_v0 }
  0x53   :  { %p993_p8 = pnand %p992_p7, %p986_p4 }
  0x55   :  { %820 = vmatpush3.bf16.msra.mxu0 %v882_v13 }
  0x56   :  { %831 = vmatprep.subr.bf16.mxu0 %v1023_v0 }
 0x123   :  { %v131_v6 = vpop.f32.mrb[0].mxu0 }
 0x124   :  { %v809_v7 = vpop.f32.mrb[1].mxu0 }
 0x125   :  { %v134_v8 = vpop.f32.mrb[2].mxu0 }
 0x126   :  { %v138_v9 = vpack.c.bf16 %v134_v8, %v131_v6  ;;  %v810_v10 = vpop.f32.mrb[3].mxu0  ;;  %v883_v8 = vld [vmem:[%s1255_s3 + $0x10] sm:$0xff]  }
 0x127   :  { %v305_v10 = vsub.s32 1, %v1161_v15 }
 0x128   :  { %812 = vmatpush3.bf16.msra.mxu1 %v138_v9  ;;  %v884_v9 = vld [vmem:[%s1255_s3 + $0x18] sm:$0xff]  }
 0x129   :  { %825 = vmatprep.subr.bf16.mxu1 %v1023_v0  ;;  %v306_v12 = vrot.slane %v1164_v17, %v305_v10 }
 0x12b   :  { %814 = vmatmul.mubr.msk.bf16.vlgmr.msra.gmra.mrb[0].mxu1 %vm148_vm3, %v1146_v11 }
 0x12c   :  { %827 = vmatprep.mubr.msk.bf16.mxu1 %vm1024_vm0, %v1023_v0 }
 0x1fe   :  { %v186_v19 = vpop.f32.mrb[0].mxu1 }
 0x1ff   :  { %v187_v20 = vadd.f32 %v186_v19, %v142_v18  ;;  %v815_v21 = vpop.f32.mrb[1].mxu1 }
 0x200   :  { %v189_v22 = vpop.f32.mrb[2].mxu1 }
 0x201   :  { %v193_v23 = vmax.f32 %v187_v20, 0.0  ;;  %v190_v24 = vadd.f32 %v189_v22, %v142_v18  ;;  %v816_v25 = vpop.f32.mrb[3].mxu1 }
 0x203   :  { %v207_v26 = vmul.f32 %v193_v23, %v193_v23  ;;  %v194_v27 = vmax.f32 %v190_v24, 0.0  ;;  %v196_v28 = vsel %vm195_vm4, %v193_v23, 0.0 }
 0x205   :  { %v197_v29 = vsel %vm195_vm4, %v194_v27, 0.0  ;;  %v208_v30 = vmul.f32 %v194_v27, %v194_v27  ;;  %v209_v32 = vsel %vm195_vm4, %v207_v26, 0.0 }
 0x206   :  { %v198_v31 = vadd.f32 %v197_v29, %v196_v28 }
 0x207   :  { %v210_v33 = vsel %vm195_vm4, %v208_v30, 0.0 }
 0x208   :  { %v199_v34 = vrot.slane %v198_v31, 4  ;;  %v211_v35 = vadd.f32 %v210_v33, %v209_v32 }
 0x20a   :  { %v200_v36 = vadd.f32 %v199_v34, %v198_v31  ;;  %v212_v37 = vrot.slane %v211_v35, 4 }
 0x20c   :  { %v201_v38 = vrot.slane %v200_v36, 2  ;;  %v213_v39 = vadd.f32 %v212_v37, %v211_v35 }
 0x20e   :  { %v202_v40 = vadd.f32 %v201_v38, %v200_v36  ;;  %v214_v41 = vrot.slane %v213_v39, 2 }
 0x210   :  { %v203_v42 = vrot.slane %v202_v40, 1  ;;  %v215_v43 = vadd.f32 %v214_v41, %v213_v39 }
 0x212   :  { %v204_v44 = vadd.f32 %v203_v42, %v202_v40  ;;  %v216_v45 = vrot.slane %v215_v43, 1 }
 0x214   :  { %v206_v46 = vmul.f32 0.0625, %v204_v44  ;;  %v217_v47 = vadd.f32 %v216_v45, %v215_v43 }
 0x216   :  { %v218_v48 = vmul.f32 0.0625, %v217_v47  ;;  %v219_v49 = vmul.f32 %v206_v46, %v206_v46 }
 0x218   :  { %v220_v50 = vsub.f32 %v218_v48, %v219_v49  ;;  %v384_v49 = vsub.s32 4, %v1161_v15 }
 0x21a   :  { %v221_v51 = vadd.f32 1e-05, %v220_v50 }
 0x21c   :  { %891 = vrsqrt.f32 %v221_v51 }
 0x226   :  { %v892_v53 = vpop.eup %891 }
 0x227   :  { %v223_v54 = vmul.f32 %v892_v53, %v1164_v17 }
 0x229   :  { %v224_v55 = vmul.f32 %v223_v54, %v206_v46  ;;  %v232_v56 = vrot.slane %v223_v54, %v231_v52 }
 0x22b   :  { %v226_v57 = vrot.slane %v224_v55, 5  ;;  %v233_v58 = vmul.f32 %v232_v56, %v193_v23  ;;  %v234_v59 = vmul.f32 %v232_v56, %v194_v27 }
 0x22d   :  { %v228_v61 = vsub.f32 %v1164_v17, %v226_v57  ;;  %v390_v57 = vsub.s32 7, %v1161_v15 }
 0x22f   :  { %v238_v62 = vrot.slane %v228_v61, %v237_v60 }
 0x231   :  { %v239_v63 = vadd.f32 %v238_v62, %v233_v58  ;;  %v240_v1 = vadd.f32 %v238_v62, %v234_v59  ;;  %v885_v62 = vld [vmem:[#allocation7 + $0x10] sm:$0xff]  }
 0x233   :  { %v1177_v2 = vpack.c.bf16 %v240_v1, %v239_v63  ;;  %v886_v1 = vld [vmem:[#allocation7 + $0x18] sm:$0xff]  }
 0x235   :  { %822 = vmatmul.mubr.msk.bf16.vlgmr.msra.gmra.mrb[4].mxu0 %vm195_vm4, %v1177_v2 }
 0x236   :  { %835 = vmatprep.mubr.msk.bf16.mxu0 %vm1024_vm0, %v1023_v0  ;;  %832 = vmatpush3.bf16.msra.mxu0 %v883_v8  ;;  %v887_v8 = vld [vmem:[#allocation7] sm:$0xff]  }
 0x237   :  { %833 = vmatprep.subr.bf16.mxu0 %v1023_v0 }
 0x23a   :  { %834 = vmatpush3.bf16.msra.mxu0 %v884_v9 }
 0x23b   :  { %845 = vmatprep.subr.bf16.mxu0 %v1023_v0 }
 0x308   :  { %v295_v3 = vpop.f32.mrb[4].mxu0 }
 0x309   :  { %v823_v4 = vpop.f32.mrb[5].mxu0 }
 0x30a   :  { %v298_v5 = vpop.f32.mrb[6].mxu0 }
 0x30b   :  { %v302_v6 = vpack.c.bf16 %v298_v5, %v295_v3  ;;  %v824_v7 = vpop.f32.mrb[7].mxu0 }
 0x30d   :  { %826 = vmatpush3.bf16.msra.mxu1 %v302_v6 }
 0x30e   :  { %839 = vmatprep.subr.bf16.mxu1 %v1023_v0 }
 0x310   :  { %828 = vmatmul.mubr.msk.bf16.vlgmr.msra.gmra.mrb[4].mxu1 %vm148_vm3, %v1146_v11 }
 0x311   :  { %841 = vmatprep.mubr.msk.bf16.mxu1 %vm1024_vm0, %v1023_v0 }
 0x3e3   :  { %v341_v13 = vpop.f32.mrb[4].mxu1 }
 0x3e4   :  { %v342_v14 = vadd.f32 %v341_v13, %v306_v12  ;;  %v829_v18 = vpop.f32.mrb[5].mxu1 }
 0x3e5   :  { %v344_v19 = vpop.f32.mrb[6].mxu1  ;;  %v889_v18 = vld [vmem:[#allocation7 + $0x20] sm:$0xff]  }
 0x3e6   :  { %v348_v20 = vmax.f32 %v342_v14, 0.0  ;;  %v345_v21 = vadd.f32 %v344_v19, %v306_v12  ;;  %v830_v22 = vpop.f32.mrb[7].mxu1  ;;  %v888_v12 = vld [vmem:[#allocation7 + $0x8] sm:$0xff]   ;;  %v459_v19 = vsub.s32 2, %v1161_v15 }
 0x3e8   :  { %v360_v23 = vmul.f32 %v348_v20, %v348_v20  ;;  %v349_v24 = vmax.f32 %v345_v21, 0.0  ;;  %v350_v25 = vsel %vm195_vm4, %v348_v20, 0.0 }
 0x3ea   :  { %v351_v26 = vsel %vm195_vm4, %v349_v24, 0.0  ;;  %v361_v27 = vmul.f32 %v349_v24, %v349_v24  ;;  %v362_v29 = vsel %vm195_vm4, %v360_v23, 0.0 }
 0x3eb   :  { %v352_v28 = vadd.f32 %v351_v26, %v350_v25 }
 0x3ec   :  { %v363_v30 = vsel %vm195_vm4, %v361_v27, 0.0 }
 0x3ed   :  { %v353_v31 = vrot.slane %v352_v28, 4  ;;  %v364_v32 = vadd.f32 %v363_v30, %v362_v29 }
 0x3ef   :  { %v354_v33 = vadd.f32 %v353_v31, %v352_v28  ;;  %v365_v34 = vrot.slane %v364_v32, 4 }
 0x3f1   :  { %v355_v35 = vrot.slane %v354_v33, 2  ;;  %v366_v36 = vadd.f32 %v365_v34, %v364_v32 }
 0x3f3   :  { %v356_v37 = vadd.f32 %v355_v35, %v354_v33  ;;  %v367_v38 = vrot.slane %v366_v36, 2 }
 0x3f5   :  { %v357_v39 = vrot.slane %v356_v37, 1  ;;  %v368_v40 = vadd.f32 %v367_v38, %v366_v36 }
 0x3f7   :  { %v358_v41 = vadd.f32 %v357_v39, %v356_v37  ;;  %v369_v42 = vrot.slane %v368_v40, 1 }
 0x3f9   :  { %v359_v43 = vmul.f32 0.0625, %v358_v41  ;;  %v370_v44 = vadd.f32 %v369_v42, %v368_v40 }
 0x3fb   :  { %v371_v45 = vmul.f32 0.0625, %v370_v44  ;;  %v372_v46 = vmul.f32 %v359_v43, %v359_v43 }
 0x3fd   :  { %v373_v47 = vsub.f32 %v371_v45, %v372_v46 }
 0x3ff   :  { %v374_v48 = vadd.f32 1e-05, %v373_v47 }
 0x401   :  { %893 = vrsqrt.f32 %v374_v48 }
 0x40b   :  { %v894_v50 = vpop.eup %893 }
 0x40c   :  { %v376_v51 = vmul.f32 %v894_v50, %v1164_v17 }
 0x40e   :  { %v377_v52 = vmul.f32 %v376_v51, %v359_v43  ;;  %v385_v53 = vrot.slane %v376_v51, %v384_v49 }
 0x410   :  { %v379_v54 = vrot.slane %v377_v52, 5  ;;  %v386_v55 = vmul.f32 %v385_v53, %v348_v20  ;;  %v387_v56 = vmul.f32 %v385_v53, %v349_v24  ;;  %v460_v20 = vrot.slane %v1164_v17, %v459_v19 }
 0x412   :  { %v381_v58 = vsub.f32 %v1164_v17, %v379_v54 }
 0x414   :  { %v391_v59 = vrot.slane %v381_v58, %v390_v57  ;;  %v538_v58 = vsub.s32 5, %v1161_v15 }
 0x416   :  { %v392_v60 = vadd.f32 %v391_v59, %v386_v55  ;;  %v393_v61 = vadd.f32 %v391_v59, %v387_v56 }
 0x418   :  { %v399_v63 = vpack.c.bf16 %v393_v61, %v392_v60 }
 0x41a   :  { %836 = vmatmul.mubr.msk.bf16.vlgmr.msra.gmra.mrb[8].mxu0 %vm195_vm4, %v399_v63 }
 0x41b   :  { %846 = vmatpush3.bf16.msra.mxu0 %v885_v62  ;;  %849 = vmatprep.mubr.msk.bf16.mxu0 %vm1024_vm0, %v1023_v0 }
 0x41c   :  { %847 = vmatprep.subr.bf16.mxu0 %v1023_v0 }
 0x41f   :  { %848 = vmatpush3.bf16.msra.mxu0 %v886_v1 }
 0x420   :  { %861 = vmatprep.subr.bf16.mxu0 %v1023_v0 }
 0x422   :  { %850 = vmatmul.mubr.msk.bf16.vlgmr.msra.gmra.mrb[12].mxu0 %vm195_vm4, %v399_v63  ;;  %v86_v63 = vld [vmem:[#allocation8 + $0x8] sm:$0x1] }
 0x423   :  { %865 = vmatprep.mubr.msk.bf16.mxu0 %vm1024_vm0, %v1023_v0  ;;  %862 = vmatpush3.bf16.msra.mxu0 %v889_v18 }
 0x424   :  { %863 = vmatprep.subr.bf16.mxu0 %v1023_v0 }
 0x4ed   :  { %v449_v3 = vpop.f32.mrb[8].mxu0 }
 0x4ee   :  { %v837_v4 = vpop.f32.mrb[9].mxu0 }
 0x4ef   :  { %v452_v5 = vpop.f32.mrb[10].mxu0 }
 0x4f0   :  { %v456_v6 = vpack.c.bf16 %v452_v5, %v449_v3  ;;  %v838_v7 = vpop.f32.mrb[11].mxu0 }
 0x4f2   :  { %840 = vmatpush3.bf16.msra.mxu1 %v456_v6 }
 0x4f3   :  { %853 = vmatprep.subr.bf16.mxu1 %v1023_v0 }
 0x4f5   :  { %842 = vmatmul.mubr.msk.bf16.vlgmr.msra.gmra.mrb[8].mxu1 %vm148_vm3, %v1146_v11  ;;  %v603_v9 = vpop.f32.mrb[12].mxu0  ;;  %v890_v11 = vld [vmem:[#allocation7 + $0x28] sm:$0xff]  }
 0x4f6   :  { %v851_v10 = vpop.f32.mrb[13].mxu0  ;;  %854 = vmatpush3.bf16.msra.mxu1 %v887_v8  ;;  %857 = vmatprep.mubr.msk.bf16.mxu1 %vm1024_vm0, %v1023_v0 }
 0x4f7   :  { %v606_v13 = vpop.f32.mrb[14].mxu0  ;;  %855 = vmatprep.subr.bf16.mxu1 %v1023_v0  ;;  %864 = vmatpush3.bf16.msra.mxu0 %v890_v11 }
 0x4f8   :  { %v852_v14 = vpop.f32.mrb[15].mxu0 }
 0x4fa   :  { %856 = vmatpush3.bf16.msra.mxu1 %v888_v12 }
 0x4fd   :  { %858 = vmatmul.mubr.msk.bf16.vlgmr.msra.gmra.mrb[12].mxu1 %vm195_vm4, %v1177_v2 }
 0x5c8   :  { %v495_v21 = vpop.f32.mrb[8].mxu1 }
 0x5c9   :  { %v496_v22 = vadd.f32 %v495_v21, %v460_v20  ;;  %v843_v23 = vpop.f32.mrb[9].mxu1 }
 0x5ca   :  { %v498_v24 = vpop.f32.mrb[10].mxu1 }
 0x5cb   :  { %v502_v25 = vmax.f32 %v496_v22, 0.0  ;;  %v499_v26 = vadd.f32 %v498_v24, %v460_v20  ;;  %v844_v27 = vpop.f32.mrb[11].mxu1 }
 0x5cd   :  { %v514_v28 = vmul.f32 %v502_v25, %v502_v25  ;;  %v503_v29 = vmax.f32 %v499_v26, 0.0  ;;  %v504_v2 = vsel %vm195_vm4, %v502_v25, 0.0 }
 0x5cf   :  { %v505_v30 = vsel %vm195_vm4, %v503_v29, 0.0  ;;  %v515_v0 = vmul.f32 %v503_v29, %v503_v29  ;;  %v516_v33 = vsel %vm195_vm4, %v514_v28, 0.0 }
 0x5d0   :  { %v506_v31 = vadd.f32 %v505_v30, %v504_v2  ;;  %v656_v32 = vpop.f32.mrb[12].mxu1 }
 0x5d1   :  { %v517_v34 = vsel %vm195_vm4, %v515_v0, 0.0  ;;  %v657_v35 = vadd.f32 %v656_v32, %v603_v9  ;;  %v859_v36 = vpop.f32.mrb[13].mxu1 }
 0x5d2   :  { %v507_v37 = vrot.slane %v506_v31, 4  ;;  %v518_v38 = vadd.f32 %v517_v34, %v516_v33  ;;  %v659_v39 = vpop.f32.mrb[14].mxu1 }
 0x5d3   :  { %v660_v40 = vadd.f32 %v659_v39, %v606_v13  ;;  %v860_v41 = vpop.f32.mrb[15].mxu1 }
 0x5d4   :  { %v508_v42 = vadd.f32 %v507_v37, %v506_v31  ;;  %v519_v43 = vrot.slane %v518_v38, 4 }
 0x5d6   :  { %v509_v44 = vrot.slane %v508_v42, 2  ;;  %v520_v45 = vadd.f32 %v519_v43, %v518_v38 }
 0x5d8   :  { %v510_v46 = vadd.f32 %v509_v44, %v508_v42  ;;  %v521_v47 = vrot.slane %v520_v45, 2 }
 0x5da   :  { %v511_v48 = vrot.slane %v510_v46, 1  ;;  %v522_v49 = vadd.f32 %v521_v47, %v520_v45 }
 0x5dc   :  { %v512_v50 = vadd.f32 %v511_v48, %v510_v46  ;;  %v523_v51 = vrot.slane %v522_v49, 1 }
 0x5de   :  { %v513_v52 = vmul.f32 0.0625, %v512_v50  ;;  %v524_v53 = vadd.f32 %v523_v51, %v522_v49 }
 0x5e0   :  { %v525_v54 = vmul.f32 0.0625, %v524_v53  ;;  %v526_v55 = vmul.f32 %v513_v52, %v513_v52 }
 0x5e2   :  { %v527_v56 = vsub.f32 %v525_v54, %v526_v55 }
 0x5e4   :  { %v528_v57 = vadd.f32 1e-05, %v527_v56 }
 0x5e6   :  { %895 = vrsqrt.f32 %v528_v57 }
 0x5f0   :  { %v896_v59 = vpop.eup %895 }
 0x5f1   :  { %v530_v60 = vmul.f32 %v896_v59, %v1164_v17  ;;  %v781_v17 = vld [vmem:[%s1258_s6] ss:$0 sm:$0xff] }
 0x5f3   :  { %v531_v61 = vmul.f32 %v530_v60, %v513_v52  ;;  %v539_v62 = vrot.slane %v530_v60, %v538_v58 }
 0x5f5   :  { %v533_v1 = vrot.slane %v531_v61, 5  ;;  %v540_v3 = vmul.f32 %v539_v62, %v502_v25  ;;  %v541_v4 = vmul.f32 %v539_v62, %v503_v29 }
 0x5f7   :  { %v535_v5 = vsub.f32 %v86_v63, %v533_v1 }
 0x5f9   :  { %v545_v6 = vrot.slane %v535_v5, %v141_v16 }
 0x5fb   :  { %v546_v7 = vadd.f32 %v545_v6, %v540_v3  ;;  %v547_v8 = vadd.f32 %v545_v6, %v541_v4 }
 0x5fd   :  { %v663_v9 = vpack.c.bf16 %v547_v8, %v546_v7 }
 0x5ff   :  { %866 = vmatmul.mubr.msk.bf16.vlgmr.msra.gmra.mrb[16].mxu0 %vm195_vm4, %v663_v9 }
 0x6d2   :  { %v718_v10 = vpop.f32.mrb[16].mxu0 }
 0x6d3   :  { %v725_v12 = vadd.f32 %v718_v10, %v657_v35  ;;  %v867_v13 = vpop.f32.mrb[17].mxu0 }
 0x6d4   :  { %v721_v14 = vpop.f32.mrb[18].mxu0 }
 0x6d5   :  { %v734_v18 = vadd.f32 %v781_v17, %v725_v12  ;;  %v726_v11 = vadd.f32 %v721_v14, %v660_v40  ;;  %v868_v19 = vpop.f32.mrb[19].mxu0 }
 0x6d7   :  { %736 = vst [vmem:[#allocation10] sm:$0xff] %v734_v18  ;;  %v735_v15 = vadd.f32 %v781_v17, %v726_v11 }
 0x6d9   :  { %737 = vst [vmem:[#allocation10 + $0x8] sm:$0xff] %v735_v15 }
 0x6da   :  { %996 = shalt.err (!%p993_p8)
}
 0x6db   :  { %s997_s17 = scalar_lea.hbm %s1259_s7, 256 }
 0x6dc   :  { %p998_p9 = scmp.ne.s32.totalorder %s1259_s7, %s997_s17  ;;  %p1001_p10 = scmp.lt.u32.totalorder %s997_s17, %s1259_s7 }
 0x6de   :  { %p1003_p11 = pnand %p1001_p10, %p998_p9 }
 0x6e0   :  { %1006 = shalt.err (!%p1003_p11)
}
 0x6e1   :  { %749 = dma.vmem_to_hbm [thread:$0]  %s744_s27, 256, %s1259_s7, [#allocation4], %s1021_s4, %s1021_s4, %s1022_s2  }
 0x6e2   :  { %1013 = dma.done.wait [#allocation4], 256  }
 0x6e3   :  { %1014 = vsyncadd [#allocation4], 4294967040 }
 0x6e4   :  { %753 = vsyncpa [#allocation3], 1 }
 0x6e5   :  { %754 = vsyncpa [#allocation6], 1 }
 0x6e6   :  { %755 = vsyncpa [#allocation9], 1 }
 0x6e7   :  { %756 = vsyncpa [#allocation4], 1 }

</bundles_post_ra>
